<compile_context>
chip_gen: v5e
topology: v5e:2x2
jax: 0.10.0
libtpu: 0.0.40
codegen_flags: <defaults>
</compile_context>

<pallas_src>
import jax
import jax.numpy as jnp
from jax.experimental import pallas as pl
from jax.experimental.pallas import tpu as pltpu

LANE = 128
SUBLANE = 8
BF16_SUBLANE = 16            # bf16 native tile is (16, 128)
TILE_B_MAX = 4096            # safe inside v5e's 16 MiB default scoped VMEM; big enough to amortize step overhead
VMEM_LIMIT_BYTES = 32 * 1024 * 1024


def _round_up(n, m):
    return ((n + m - 1) // m) * m


def critic_kernel(xt_ref, w1_ref, w2_ref, w3_ref, o_ref):
    # Transposed layout: features on sublanes, batch on lanes. Biases are folded
    # into the matmuls (ones row in xt, carry-one hidden unit at H_pad-1), so the
    # body is pure MXU + ReLU + bf16 casts.
    h1 = jnp.dot(w1_ref[...], xt_ref[...], preferred_element_type=jnp.float32)
    h1 = jnp.maximum(h1, 0.0)                                  # (H_pad, TB) f32
    h2 = jnp.dot(w2_ref[...], h1.astype(w2_ref.dtype),
                 preferred_element_type=jnp.float32)
    h2 = jnp.maximum(h2, 0.0)                                  # (H_pad, TB) f32
    out = jnp.dot(w3_ref[...], h2.astype(w3_ref.dtype),
                  preferred_element_type=jnp.float32)          # (8, TB) f32; row 0 holds the value
    o_ref[...] = out[0:1, :].astype(o_ref.dtype)               # (1, TB) lane-dense unmasked store


def prepare_critic_params(params):
    """One-time layout plumbing: transpose + zero-pad + bf16 cast + bias folding.

    Returns (w1t, w2t, w3r):
      w1t: (H_pad, S_pad)  rows 0..H-1 = W1^T, column S_pad-1 = b1, (H_pad-1,S_pad-1)=1
      w2t: (H_pad, H_pad)  rows/cols 0..H-1 = W2^T, column H_pad-1 = b2, (H_pad-1,H_pad-1)=1
      w3r: (8, H_pad)      row 0 = [w3 | 0.. | b3]
    """
    f32, bf16 = jnp.float32, jnp.bfloat16
    w1, b1, w2, b2, w3, b3 = (jnp.asarray(params[k], f32)
                              for k in ("w1", "b1", "w2", "b2", "w3", "b3"))
    S, H = w1.shape
    S_pad = _round_up(S + 1, BF16_SUBLANE)   # +1: ones row that injects b1 into layer 1
    H_pad = _round_up(H + 1, LANE)           # +1: carry-one hidden unit for b2 / b3

    w1t = jnp.zeros((H_pad, S_pad), bf16)
    w1t = w1t.at[:H, :S].set(w1.T.astype(bf16))
    w1t = w1t.at[:H, S_pad - 1].set(b1.reshape(-1).astype(bf16))
    w1t = w1t.at[H_pad - 1, S_pad - 1].set(1.0)     # h1[H_pad-1,:] = relu(1) = 1

    w2t = jnp.zeros((H_pad, H_pad), bf16)
    w2t = w2t.at[:H, :H].set(w2.T.astype(bf16))
    w2t = w2t.at[:H, H_pad - 1].set(b2.reshape(-1).astype(bf16))
    w2t = w2t.at[H_pad - 1, H_pad - 1].set(1.0)     # h2[H_pad-1,:] = relu(1) = 1

    w3r = jnp.zeros((SUBLANE, H_pad), bf16)
    w3r = w3r.at[0, :H].set(w3.reshape(-1).astype(bf16))
    w3r = w3r.at[0, H_pad - 1].set(b3.reshape(-1)[0].astype(bf16))
    return w1t, w2t, w3r


def critic_forward(x, w1t, w2t, w3r):
    """x: (B, state_dim) f32; prepared params from prepare_critic_params. -> (B, 1) f32."""
    B, S = x.shape
    H_pad, S_pad = w1t.shape
    assert S <= S_pad - 1, "x feature dim inconsistent with prepared params"
    f32, bf16 = jnp.float32, jnp.bfloat16

    # Lane-dense batch tiling (multiples of 128). Split into >=2 tiles when possible
    # so the "parallel" grid axis actually shards across v7x's two TensorCores.
    B_pad = _round_up(max(B, 1), LANE)
    if B_pad >= 2 * LANE:
        tile_b = max(LANE, min(TILE_B_MAX, ((B_pad // 2) // LANE) * LANE))
        B_pad = _round_up(B_pad, tile_b)
    else:
        tile_b = B_pad
    grid = (B_pad // tile_b,)

    # Per-call plumbing for x only: transpose (batch -> lanes), zero-pad, bf16 cast,
    # plus the ones row (index S_pad-1) that folds b1 into the layer-1 matmul.
    xt = jnp.zeros((S_pad, B_pad), bf16)
    xt = xt.at[:S, :B].set(x.T.astype(bf16))
    xt = xt.at[S_pad - 1, :].set(jnp.ones((B_pad,), bf16))

    resident = lambda a: pl.BlockSpec(a.shape, lambda i: (0, 0))  # VMEM-resident weights

    cost = pl.CostEstimate(
        flops=2 * B_pad * (H_pad * S_pad + H_pad * H_pad + SUBLANE * H_pad),
        transcendentals=0,
        bytes_accessed=(xt.size * 2 + B_pad * 4
                        + (w1t.size + w2t.size + w3r.size) * 2),
    )

    out_row = pl.pallas_call(
        critic_kernel,
        out_shape=jax.ShapeDtypeStruct((1, B_pad), f32),
        grid=grid,
        in_specs=[
            pl.BlockSpec((S_pad, tile_b), lambda i: (0, i)),   # x tile (batch on lanes)
            resident(w1t), resident(w2t), resident(w3r),
        ],
        out_specs=pl.BlockSpec((1, tile_b), lambda i: (0, i)),
        compiler_params=pltpu.CompilerParams(
            dimension_semantics=("parallel",),
            vmem_limit_bytes=VMEM_LIMIT_BYTES,
        ),
        cost_estimate=cost,
    )(xt, w1t, w2t, w3r)

    # (1, B_pad) lane-dense row -> (B, 1) column; pure reshape + slice.
    return out_row.reshape(B_pad, 1)[:B]


def init_critic_params(key, state_dim, hidden_dim=64):
    """PyTorch-default-like init: U(-1/sqrt(fan_in), 1/sqrt(fan_in)); weights (in, out)."""
    ks = jax.random.split(key, 6)

    def lin(kw, kb, fan_in, fan_out):
        bound = 1.0 / jnp.sqrt(jnp.float32(fan_in))
        w = jax.random.uniform(kw, (fan_in, fan_out), jnp.float32, -bound, bound)
        b = jax.random.uniform(kb, (1, fan_out), jnp.float32, -bound, bound)
        return w, b

    w1, b1 = lin(ks[0], ks[1], state_dim, hidden_dim)
    w2, b2 = lin(ks[2], ks[3], hidden_dim, hidden_dim)
    w3, b3 = lin(ks[4], ks[5], hidden_dim, 1)
    return {"w1": w1, "b1": b1, "w2": w2, "b2": b2, "w3": w3, "b3": b3}


def critic_ref(x, params):
    """Pure-JAX reference matching the kernel's numerics (bf16 MXU operands, f32 acc)."""
    f32, bf16 = jnp.float32, jnp.bfloat16

    def lin(h, w, b):
        return (jnp.dot(h.astype(bf16), w.astype(bf16), preferred_element_type=f32)
                + b.astype(bf16).astype(f32))

    h = jnp.maximum(lin(x, params["w1"], params["b1"]), 0.0)
    h = jnp.maximum(lin(h, params["w2"], params["b2"]), 0.0)
    return lin(h, params["w3"], params["b3"])


if __name__ == "__main__":
    key = jax.random.PRNGKey(0)
    k_x, k_p, k_xl = jax.random.split(key, 3)

    batch, state_dim, hidden_dim = 8, 4, 64          # CartPole: state_dim=4
    params = init_critic_params(k_p, state_dim, hidden_dim)
    prep = prepare_critic_params(params)             # one-time pad/transpose/cast/bias-fold
    fwd = jax.jit(critic_forward)

    # Small-batch check (single grid step).
    x = jax.random.normal(k_x, (batch, state_dim), jnp.float32)
    out = jax.block_until_ready(fwd(x, *prep))
    ref = critic_ref(x, params)
    assert out.shape == (batch, 1)
    assert jnp.allclose(out, ref, atol=1e-3, rtol=1e-3)

    # Ragged larger batch: exercises multi-tile grid (>= 2 "parallel" steps) + padding.
    xl = jax.random.normal(k_xl, (1000, state_dim), jnp.float32)
    out_l = jax.block_until_ready(fwd(xl, *prep))
    ref_l = critic_ref(xl, params)
    assert out_l.shape == (1000, 1)
    assert jnp.allclose(out_l, ref_l, atol=1e-3, rtol=1e-3)

    print("KERNEL_OK")
</pallas_src>

<mosaic_0001>
module attributes {stable_mosaic.version = 11 : i64} {
  func.func @critic_kernel(%arg0: i32, %arg1: memref<16x128xbf16, #tpu.memory_space<vmem>>, %arg2: memref<128x16xbf16, #tpu.memory_space<vmem>>, %arg3: memref<128x128xbf16, #tpu.memory_space<vmem>>, %arg4: memref<8x128xbf16, #tpu.memory_space<vmem>>, %arg5: memref<1x128xf32, #tpu.memory_space<vmem>>) attributes {dimension_semantics = [#tpu.dimension_semantics<parallel>], iteration_bounds = array<i64: 1>, scalar_prefetch = 0 : i64, scratch_operands = 0 : i64, tpu.core_type = #tpu.core_type<tc>, window_params = [{transform_indices = @transform_0, window_bounds = array<i64: 16, 128>}, {pipeline_mode = #tpu.pipeline_mode<synchronous>, transform_indices = @transform_1, window_bounds = array<i64: 128, 16>}, {pipeline_mode = #tpu.pipeline_mode<synchronous>, transform_indices = @transform_2, window_bounds = array<i64: 128, 128>}, {pipeline_mode = #tpu.pipeline_mode<synchronous>, transform_indices = @transform_3, window_bounds = array<i64: 8, 128>}, {transform_indices = @transform_4, window_bounds = array<i64: 1, 128>}]} {
    %c0 = arith.constant 0 : index
    %c0_0 = arith.constant 0 : index
    %0 = vector.load %arg2[%c0, %c0_0] : memref<128x16xbf16, #tpu.memory_space<vmem>>, vector<128x16xbf16>
    %c0_1 = arith.constant 0 : index
    %c0_2 = arith.constant 0 : index
    %1 = vector.load %arg1[%c0_1, %c0_2] : memref<16x128xbf16, #tpu.memory_space<vmem>>, vector<16x128xbf16>
    %cst = arith.constant dense<0.000000e+00> : vector<128x128xf32>
    %2 = tpu.matmul %0, %1, %cst {dimension_numbers = #tpu.dot_dimension_numbers<[1], [0], [0], [1], [0, 0, 1, 1], [], []>} : vector<128x16xbf16>, vector<16x128xbf16>, vector<128x128xf32> -> vector<128x128xf32>
    %cst_3 = arith.constant 0.000000e+00 : f32
    %3 = vector.broadcast %cst_3 : f32 to vector<128x128xf32>
    %4 = arith.maximumf %2, %3 : vector<128x128xf32>
    %c0_4 = arith.constant 0 : index
    %c0_5 = arith.constant 0 : index
    %5 = vector.load %arg3[%c0_4, %c0_5] : memref<128x128xbf16, #tpu.memory_space<vmem>>, vector<128x128xbf16>
    %6 = arith.truncf %4 : vector<128x128xf32> to vector<128x128xbf16>
    %cst_6 = arith.constant dense<0.000000e+00> : vector<128x128xf32>
    %7 = tpu.matmul %5, %6, %cst_6 {dimension_numbers = #tpu.dot_dimension_numbers<[1], [0], [0], [1], [0, 0, 1, 1], [], []>} : vector<128x128xbf16>, vector<128x128xbf16>, vector<128x128xf32> -> vector<128x128xf32>
    %cst_7 = arith.constant 0.000000e+00 : f32
    %8 = vector.broadcast %cst_7 : f32 to vector<128x128xf32>
    %9 = arith.maximumf %7, %8 : vector<128x128xf32>
    %c0_8 = arith.constant 0 : index
    %c0_9 = arith.constant 0 : index
    %10 = vector.load %arg4[%c0_8, %c0_9] : memref<8x128xbf16, #tpu.memory_space<vmem>>, vector<8x128xbf16>
    %11 = arith.truncf %9 : vector<128x128xf32> to vector<128x128xbf16>
    %cst_10 = arith.constant dense<0.000000e+00> : vector<8x128xf32>
    %12 = tpu.matmul %10, %11, %cst_10 {dimension_numbers = #tpu.dot_dimension_numbers<[1], [0], [0], [1], [0, 0, 1, 1], [], []>} : vector<8x128xbf16>, vector<128x128xbf16>, vector<8x128xf32> -> vector<8x128xf32>
    %13 = vector.extract_strided_slice %12 {offsets = [0, 0], sizes = [1, 128], strides = [1, 1]} : vector<8x128xf32> to vector<1x128xf32>
    %c0_11 = arith.constant 0 : index
    %c0_12 = arith.constant 0 : index
    %14 = vector.load %arg5[%c0_11, %c0_12] : memref<1x128xf32, #tpu.memory_space<vmem>>, vector<1x128xf32>
    tpu.vector_store %arg5[%c0_11, %c0_12], %13 {strides = array<i32>} : memref<1x128xf32, #tpu.memory_space<vmem>>, vector<1x128xf32>,
    return
  }
  func.func @transform_0(%arg0: i32) -> (i32, i32) {
    %c0_i32 = arith.constant 0 : i32
    %c0_i32_0 = arith.constant 0 : i32
    return %c0_i32, %arg0 : i32, i32
  }
  func.func @transform_1(%arg0: i32) -> (i32, i32) {
    %c0_i32 = arith.constant 0 : i32
    %c0_i32_0 = arith.constant 0 : i32
    %c0_i32_1 = arith.constant 0 : i32
    return %c0_i32, %c0_i32_0 : i32, i32
  }
  func.func @transform_2(%arg0: i32) -> (i32, i32) {
    %c0_i32 = arith.constant 0 : i32
    %c0_i32_0 = arith.constant 0 : i32
    %c0_i32_1 = arith.constant 0 : i32
    return %c0_i32, %c0_i32_0 : i32, i32
  }
  func.func @transform_3(%arg0: i32) -> (i32, i32) {
    %c0_i32 = arith.constant 0 : i32
    %c0_i32_0 = arith.constant 0 : i32
    %c0_i32_1 = arith.constant 0 : i32
    return %c0_i32, %c0_i32_0 : i32, i32
  }
  func.func @transform_4(%arg0: i32) -> (i32, i32) {
    %c0_i32 = arith.constant 0 : i32
    %c0_i32_0 = arith.constant 0 : i32
    return %c0_i32, %arg0 : i32, i32
  }
}

</mosaic_0001>

<bundles_post_ra>
// kernel: critic_forward.1
= control target key start
LH: loop header
LB: loop body
LE: loop exit
PB: predicated region body
PF: predicated region fallthrough
CT: control target
= control target key end

     0   :  { %vm82_vm0 = vcmask 130048   ;;  %s520_s0 = inlined_call_operand.vmem [shape: bf16[16,128], index: 0, kind: input, shape index: {}]   ;;  %s521_s1 = inlined_call_operand.vmem [shape: bf16[128,16], index: 1, kind: input, shape index: {}]   ;;  %s522_s2 = inlined_call_operand.vmem [shape: bf16[128,128], index: 2, kind: input, shape index: {}]   ;;  %s523_s3 = inlined_call_operand.vmem [shape: bf16[8,128], index: 3, kind: input, shape index: {}]   ;;  %s524_s4 = inlined_call_operand.vmem [shape: f32[1,128], index: 4, kind: output, shape index: {}]  }
   0x1   :  { %v420_v0 = vld [vmem:[%s520_s0] sm:$0xff]  ;;  %v418_v2 = vld [vmem:[%s521_s1 + $0x30] sm:$0xff]  ;;  %v413_v3 = vld [vmem:[%s521_s1 + $0x8] sm:$0xff] }
   0x2   :  { %v412_v1 = vld [vmem:[%s521_s1] sm:$0xff]  ;;  %114 = vmatpush.bf16.msra.mxu0 %v420_v0  ;;  %429 = vmatpush.bf16.msra.mxu2 %v420_v0  ;;  %v419_v4 = vld [vmem:[%s521_s1 + $0x38] sm:$0xff]  ;;  %v414_v5 = vld [vmem:[%s521_s1 + $0x10] sm:$0xff] }
   0x3   :  { %v415_v6 = vld [vmem:[%s521_s1 + $0x18] sm:$0xff]  ;;  %v416_v7 = vld [vmem:[%s521_s1 + $0x20] sm:$0xff]  ;;  %v417_v8 = vld [vmem:[%s521_s1 + $0x28] sm:$0xff] }
   0x4   :  { %v425_v49 = vld [vmem:[%s522_s2 + $0x20] sm:$0xff]  ;;  %v426_v51 = vld [vmem:[%s522_s2 + $0x28] sm:$0xff]  ;;  %v427_v53 = vld [vmem:[%s522_s2 + $0x30] sm:$0xff] }
   0x5   :  { %372 = vmatmul.msk.bf16.vlgmr.msra.gmra.mxu0 %vm82_vm0, %v412_v1  ;;  %378 = vmatmul.msk.bf16.vlgmr.msra.gmra.mxu2 %vm82_vm0, %v418_v2  ;;  %v421_v50 = vld [vmem:[%s522_s2] sm:$0xff]  ;;  %v422_v52 = vld [vmem:[%s522_s2 + $0x8] sm:$0xff]  ;;  %v423_v54 = vld [vmem:[%s522_s2 + $0x10] sm:$0xff] }
   0x6   :  { %v428_v55 = vld [vmem:[%s522_s2 + $0x38] sm:$0xff] }
   0x7   :  { %v424_v56 = vld [vmem:[%s522_s2 + $0x18] sm:$0xff] }
  0x15   :  { %373 = vmatmul.msk.bf16.gmra.mxu0 %vm82_vm0, %v413_v3  ;;  %379 = vmatmul.msk.bf16.gmra.mxu2 %vm82_vm0, %v419_v4 }
  0x25   :  { %374 = vmatmul.msk.bf16.gmra.mxu0 %vm82_vm0, %v414_v5 }
  0x35   :  { %375 = vmatmul.msk.bf16.gmra.mxu0 %vm82_vm0, %v415_v6 }
  0x45   :  { %376 = vmatmul.msk.bf16.gmra.mxu0 %vm82_vm0, %v416_v7 }
  0x55   :  { %377 = vmatmul.msk.bf16.gmra.mxu0 %vm82_vm0, %v417_v8 }
  0x82   :  { %v116_v9 = vpop.f32.mrf.mxu0 }
  0x83   :  { %v156_v12 = vmax.f32 %v116_v9, 0.0 }
  0x88   :  { %v146_v10 = vpop.f32.mrf.mxu2 }
  0x89   :  { %v168_v24 = vmax.f32 %v146_v10, 0.0 }
  0x8a   :  { %v118_v11 = vpop.f32.mrf.mxu0 }
  0x8b   :  { %v157_v13 = vmax.f32 %v118_v11, 0.0 }
  0x8d   :  { %v188_v14 = vpack.c.bf16 %v157_v13, %v156_v12 }
  0x90   :  { %v148_v15 = vpop.f32.mrf.mxu2 }
  0x91   :  { %v169_v25 = vmax.f32 %v148_v15, 0.0 }
  0x92   :  { %v121_v16 = vpop.f32.mrf.mxu0 }
  0x93   :  { %v158_v19 = vmax.f32 %v121_v16, 0.0  ;;  %v194_v29 = vpack.c.bf16 %v169_v25, %v168_v24 }
  0x98   :  { %v151_v17 = vpop.f32.mrf.mxu2 }
  0x99   :  { %v170_v22 = vmax.f32 %v151_v17, 0.0 }
  0x9a   :  { %v123_v18 = vpop.f32.mrf.mxu0 }
  0x9b   :  { %v159_v20 = vmax.f32 %v123_v18, 0.0 }
  0x9d   :  { %v189_v21 = vpack.c.bf16 %v159_v20, %v158_v19 }
  0xa0   :  { %v153_v23 = vpop.f32.mrf.mxu2 }
  0xa1   :  { %v171_v26 = vmax.f32 %v153_v23, 0.0 }
  0xa2   :  { %v126_v27 = vpop.f32.mrf.mxu0 }
  0xa3   :  { %v195_v28 = vpack.c.bf16 %v171_v26, %v170_v22  ;;  %v160_v47 = vmax.f32 %v126_v27, 0.0 }
  0xa5   :  { %244 = vmatpush.bf16.msra.mxu1 %v195_v28  ;;  %430 = vmatpush.bf16.msra.mxu3 %v195_v28 }
  0xa9   :  { %245 = vmatpush.bf16.msra.mxu1 %v194_v29  ;;  %431 = vmatpush.bf16.msra.mxu3 %v194_v29 }
  0xaa   :  { %v128_v30 = vpop.f32.mrf.mxu0 }
  0xab   :  { %v161_v45 = vmax.f32 %v128_v30, 0.0 }
  0xad   :  { %v190_v48 = vpack.c.bf16 %v161_v45, %v160_v47 }
  0xb2   :  { %v131_v31 = vpop.f32.mrf.mxu0 }
  0xb3   :  { %v162_v44 = vmax.f32 %v131_v31, 0.0 }
  0xba   :  { %v133_v32 = vpop.f32.mrf.mxu0 }
  0xbb   :  { %v163_v42 = vmax.f32 %v133_v32, 0.0 }
  0xbd   :  { %v191_v46 = vpack.c.bf16 %v163_v42, %v162_v44 }
  0xc2   :  { %v136_v33 = vpop.f32.mrf.mxu0 }
  0xc3   :  { %v164_v41 = vmax.f32 %v136_v33, 0.0  ;;  %v309_v33 = vld [vmem:[%s523_s3] sm:$0xf] }
  0xca   :  { %v138_v34 = vpop.f32.mrf.mxu0 }
  0xcb   :  { %v165_v39 = vmax.f32 %v138_v34, 0.0 }
  0xcd   :  { %v192_v43 = vpack.c.bf16 %v165_v39, %v164_v41 }
  0xd2   :  { %v141_v35 = vpop.f32.mrf.mxu0 }
  0xd3   :  { %v166_v37 = vmax.f32 %v141_v35, 0.0 }
  0xda   :  { %v143_v36 = vpop.f32.mrf.mxu0 }
  0xdb   :  { %v167_v38 = vmax.f32 %v143_v36, 0.0 }
  0xdd   :  { %v193_v40 = vpack.c.bf16 %v167_v38, %v166_v37 }
  0xdf   :  { %246 = vmatpush.bf16.msra.mxu1 %v193_v40  ;;  %432 = vmatpush.bf16.msra.mxu3 %v193_v40 }
  0xe3   :  { %247 = vmatpush.bf16.msra.mxu1 %v192_v43  ;;  %433 = vmatpush.bf16.msra.mxu3 %v192_v43 }
  0xe7   :  { %248 = vmatpush.bf16.msra.mxu1 %v191_v46  ;;  %434 = vmatpush.bf16.msra.mxu3 %v191_v46 }
  0xeb   :  { %249 = vmatpush.bf16.msra.mxu1 %v190_v48  ;;  %435 = vmatpush.bf16.msra.mxu3 %v190_v48 }
  0xef   :  { %250 = vmatpush.bf16.msra.mxu1 %v189_v21  ;;  %436 = vmatpush.bf16.msra.mxu3 %v189_v21 }
  0xf3   :  { %251 = vmatpush.bf16.msra.mxu1 %v188_v14  ;;  %437 = vmatpush.bf16.msra.mxu3 %v188_v14 }
  0xf6   :  { %272 = vmatmul.bf16.vlgmr.msra.gmra.mxu3 %v425_v49  ;;  %252 = vmatmul.bf16.vlgmr.msra.gmra.mxu1 %v421_v50 }
 0x106   :  { %277 = vmatmul.bf16.gmra.mxu3 %v426_v51  ;;  %257 = vmatmul.bf16.gmra.mxu1 %v422_v52 }
 0x116   :  { %282 = vmatmul.bf16.gmra.mxu3 %v427_v53  ;;  %262 = vmatmul.bf16.gmra.mxu1 %v423_v54 }
 0x126   :  { %287 = vmatmul.bf16.gmra.mxu3 %v428_v55  ;;  %267 = vmatmul.bf16.gmra.mxu1 %v424_v56 }
 0x173   :  { %v253_v57 = vpop.f32.mrf.mxu1 }
 0x174   :  { %v293_v29 = vmax.f32 %v253_v57, 0.0 }
 0x179   :  { %v273_v58 = vpop.f32.mrf.mxu3 }
 0x17a   :  { %v301_v19 = vmax.f32 %v273_v58, 0.0 }
 0x17b   :  { %v255_v60 = vpop.f32.mrf.mxu1 }
 0x17c   :  { %v294_v30 = vmax.f32 %v255_v60, 0.0 }
 0x17e   :  { %v310_v32 = vpack.c.bf16 %v294_v30, %v293_v29 }
 0x181   :  { %v275_v59 = vpop.f32.mrf.mxu3 }
 0x182   :  { %v302_v16 = vmax.f32 %v275_v59, 0.0 }
 0x183   :  { %v258_v62 = vpop.f32.mrf.mxu1 }
 0x184   :  { %v314_v22 = vpack.c.bf16 %v302_v16, %v301_v19  ;;  %v295_v26 = vmax.f32 %v258_v62, 0.0 }
 0x189   :  { %v278_v61 = vpop.f32.mrf.mxu3 }
 0x18a   :  { %v303_v15 = vmax.f32 %v278_v61, 0.0 }
 0x18b   :  { %v260_v0 = vpop.f32.mrf.mxu1 }
 0x18c   :  { %v296_v27 = vmax.f32 %v260_v0, 0.0 }
 0x18e   :  { %v311_v31 = vpack.c.bf16 %v296_v27, %v295_v26 }
 0x191   :  { %v280_v63 = vpop.f32.mrf.mxu3 }
 0x192   :  { %v304_v13 = vmax.f32 %v280_v63, 0.0 }
 0x193   :  { %v263_v2 = vpop.f32.mrf.mxu1 }
 0x194   :  { %v315_v17 = vpack.c.bf16 %v304_v13, %v303_v15  ;;  %v297_v23 = vmax.f32 %v263_v2, 0.0 }
 0x199   :  { %v283_v1 = vpop.f32.mrf.mxu3 }
 0x19a   :  { %v305_v12 = vmax.f32 %v283_v1, 0.0 }
 0x19b   :  { %v265_v4 = vpop.f32.mrf.mxu1 }
 0x19c   :  { %v298_v24 = vmax.f32 %v265_v4, 0.0 }
 0x19e   :  { %v312_v28 = vpack.c.bf16 %v298_v24, %v297_v23 }
 0x1a1   :  { %v285_v3 = vpop.f32.mrf.mxu3 }
 0x1a2   :  { %v306_v10 = vmax.f32 %v285_v3, 0.0 }
 0x1a3   :  { %v268_v9 = vpop.f32.mrf.mxu1 }
 0x1a4   :  { %v316_v14 = vpack.c.bf16 %v306_v10, %v305_v12  ;;  %v299_v20 = vmax.f32 %v268_v9, 0.0 }
 0x1a9   :  { %v288_v5 = vpop.f32.mrf.mxu3 }
 0x1aa   :  { %v307_v7 = vmax.f32 %v288_v5, 0.0 }
 0x1ab   :  { %v270_v18 = vpop.f32.mrf.mxu1 }
 0x1ac   :  { %v300_v21 = vmax.f32 %v270_v18, 0.0 }
 0x1ae   :  { %v313_v25 = vpack.c.bf16 %v300_v21, %v299_v20 }
 0x1b1   :  { %v290_v6 = vpop.f32.mrf.mxu3 }
 0x1b2   :  { %v308_v8 = vmax.f32 %v290_v6, 0.0 }
 0x1b4   :  { %v317_v11 = vpack.c.bf16 %v308_v8, %v307_v7 }
 0x1b6   :  { %318 = vmatpush.bf16.msrb.mxu2 %v317_v11 }
 0x1ba   :  { %319 = vmatpush.bf16.msrb.mxu2 %v316_v14 }
 0x1be   :  { %320 = vmatpush.bf16.msrb.mxu2 %v315_v17 }
 0x1c2   :  { %321 = vmatpush.bf16.msrb.mxu2 %v314_v22 }
 0x1c6   :  { %322 = vmatpush.bf16.msrb.mxu2 %v313_v25 }
 0x1ca   :  { %323 = vmatpush.bf16.msrb.mxu2 %v312_v28 }
 0x1ce   :  { %324 = vmatpush.bf16.msrb.mxu2 %v311_v31 }
 0x1d2   :  { %325 = vmatpush.bf16.msrb.mxu2 %v310_v32 }
 0x1d5   :  { %326 = vmatmul.bf16.vlgmr.msrb.gmra.mxu2 %v309_v33 }
 0x258   :  { %v327_v34 = vpop.f32.mrf.mxu2 }
 0x259   :  { %331 = vst [vmem:[%s524_s4] sm:$0x1] %v327_v34 }
 0x260   :  { %v329_v35 = vpop.f32.mrf.mxu2 }

</bundles_post_ra>
